<compile_context>
chip_gen: v5e
topology: v5e:2x2
jax: 0.10.0
libtpu: 0.0.40
codegen_flags: <defaults>
</compile_context>

<pallas_src>
import functools

import jax
import jax.numpy as jnp
from jax.experimental import pallas as pl
from jax.experimental.pallas import tpu as pltpu


_VMEM_TILE_BUDGET = 24 * 1024 * 1024   # bytes for double-buffered in + out tiles
_VMEM_LIMIT = 48 * 1024 * 1024         # scoped-VMEM request (fits v5e/v6e/v7x)


def _pad_kernel(x_ref, o_ref, *, pad_left, pad_right, mode, value):
    x = x_ref[...]                              # (tile_r, W)
    R, W = x.shape

    def reversed_slice(lo, hi):
        # reversed x[:, lo:hi]; hi - lo <= W - 1 and static, so this stays an
        # unrolled set of static single-column slices + one concatenate.
        cols = [x[:, s:s + 1] for s in range(hi - 1, lo - 1, -1)]
        return cols[0] if len(cols) == 1 else jnp.concatenate(cols, axis=1)

    pieces = []
    if pad_left > 0:
        if mode == "constant":
            left = jnp.full((R, pad_left), value, dtype=x.dtype)
        elif mode == "circular":
            left = x[:, W - pad_left:]                       # one contiguous slice
        elif mode == "replicate":
            left = jnp.broadcast_to(x[:, :1], (R, pad_left))  # one broadcast
        else:                                                 # reflect / antireflect
            left = reversed_slice(1, pad_left + 1)
            if mode == "antireflect":
                left = 2 * x[:, :1] - left                    # Y[..., l] == x[..., 0]
        pieces.append(left)

    pieces.append(x)                                          # interior, unchanged

    if pad_right > 0:
        if mode == "constant":
            right = jnp.full((R, pad_right), value, dtype=x.dtype)
        elif mode == "circular":
            right = x[:, :pad_right]
        elif mode == "replicate":
            right = jnp.broadcast_to(x[:, W - 1:], (R, pad_right))
        else:
            right = reversed_slice(W - 1 - pad_right, W - 1)
            if mode == "antireflect":
                right = 2 * x[:, W - 1:] - right              # Y[..., -r-1] == x[..., W-1]
        pieces.append(right)

    out = pieces[0] if len(pieces) == 1 else jnp.concatenate(pieces, axis=1)
    o_ref[...] = out.astype(o_ref.dtype)        # one lane-dense full-block store


def _choose_tile_r(R, W, w_out, itemsize):
    """Largest sublane-aligned row tile whose double-buffered in+out blocks
    (lane-padded VMEM footprint) fit the tile budget; capped so large R still
    gets >= 2 grid steps (v7x two-TC sharding)."""
    itemsize = max(int(itemsize), 1)
    sub = {1: 32, 2: 16}.get(itemsize, 8)        # dtype sublane packing
    lane = 128
    w_pad = pl.cdiv(W, lane) * lane              # lane-padded widths in VMEM
    wo_pad = pl.cdiv(w_out, lane) * lane
    per_row = 2 * (w_pad + wo_pad) * itemsize    # 2x: Pallas double buffering
    tile = max(sub, (_VMEM_TILE_BUDGET // per_row) // sub * sub)
    if R >= 2 * sub:
        # Keep >= 2 grid steps so ("parallel",) can shard rows across v7x's
        # two TensorCores (no effect on single-TC v5e/v6e).
        half = pl.cdiv(pl.cdiv(R, 2), sub) * sub
        tile = min(tile, half)
    return R if tile >= R else tile


def pad_sequence(x, pad_left, pad_right, mode, value=0.0, *, tile_r=None):
    """JAX/Pallas equivalent of PadSequence.forward.

    x: (H, 1, W) or (N, H, 1, W); returns same rank with W -> W + pl + pr.
    """
    assert mode in ("constant", "circular", "replicate", "reflect", "antireflect")
    d = x.ndim
    assert d in (3, 4)
    x4 = x[None] if d == 3 else x                 # (N, H, 1, W)
    N, H, one, W = x4.shape
    assert one == 1
    if mode in ("reflect", "antireflect"):
        assert pad_left <= W - 1 and pad_right <= W - 1, \
            "reflect/antireflect require pad <= W-1 (same constraint as PyTorch)"
    if mode == "circular":
        assert pad_left <= W and pad_right <= W

    R = N * H
    w_out = W + pad_left + pad_right
    x2d = x4.reshape(R, W)

    if tile_r is None:
        tile_r = _choose_tile_r(R, W, w_out, x2d.dtype.itemsize)
    tile_r = min(tile_r, R)
    grid = (pl.cdiv(R, tile_r),)

    kernel = functools.partial(_pad_kernel, pad_left=pad_left,
                               pad_right=pad_right, mode=mode, value=value)
    y2d = pl.pallas_call(
        kernel,
        out_shape=jax.ShapeDtypeStruct((R, w_out), x.dtype),
        grid=grid,
        in_specs=[pl.BlockSpec((tile_r, W), lambda i: (i, 0))],
        out_specs=pl.BlockSpec((tile_r, w_out), lambda i: (i, 0)),
        compiler_params=pltpu.CompilerParams(
            dimension_semantics=("parallel",),
            vmem_limit_bytes=_VMEM_LIMIT),
    )(x2d)

    y4 = y2d.reshape(N, H, 1, w_out)
    return y4 if d == 4 else y4[0]


def _reference(x, pad_left, pad_right, mode, value=0.0):
    """Pure-jnp reference matching F.pad semantics along the last dim."""
    cfg = [(0, 0)] * (x.ndim - 1) + [(pad_left, pad_right)]
    if mode == "constant":
        return jnp.pad(x, cfg, mode="constant", constant_values=value)
    if mode == "circular":
        return jnp.pad(x, cfg, mode="wrap")
    if mode == "replicate":
        return jnp.pad(x, cfg, mode="edge")
    if mode == "reflect":
        return jnp.pad(x, cfg, mode="reflect")
    # antireflect
    y = jnp.pad(x, cfg, mode="reflect")
    l, r = pad_left, pad_right
    left = 2.0 * y[..., l:l + 1] - y[..., :l]
    right = 2.0 * y[..., -r - 1:-r] - y[..., -r:]
    return jnp.concatenate([left, y[..., l:y.shape[-1] - r], right], axis=-1)


if __name__ == "__main__":
    key = jax.random.PRNGKey(0)
    N, H, W = 2, 4, 16
    pad_left, pad_right = 3, 4
    x4 = jax.random.normal(key, (N, H, 1, W), dtype=jnp.float32)
    x3 = x4[0]                                    # (H, 1, W) variant

    ok = True
    for mode in ("constant", "circular", "replicate", "reflect", "antireflect"):
        out4 = jax.block_until_ready(
            pad_sequence(x4, pad_left, pad_right, mode, value=0.5))
        ref4 = _reference(x4, pad_left, pad_right, mode, value=0.5)
        out3 = jax.block_until_ready(
            pad_sequence(x3, pad_left, pad_right, mode, value=0.5))
        ref3 = _reference(x3, pad_left, pad_right, mode, value=0.5)
        assert out4.shape == (N, H, 1, W + pad_left + pad_right)
        assert out3.shape == (H, 1, W + pad_left + pad_right)
        if not (jnp.allclose(out4, ref4, atol=1e-5) and
                jnp.allclose(out3, ref3, atol=1e-5)):
            ok = False
            print(f"mode {mode} mismatch")

    # Exercise grid > 1 with a ragged last row-block (R=21, tile_r=8 -> 3 steps).
    xr = jax.random.normal(jax.random.PRNGKey(1), (3, 7, 1, W), dtype=jnp.float32)
    for mode in ("replicate", "antireflect", "circular"):
        outr = jax.block_until_ready(
            pad_sequence(xr, pad_left, pad_right, mode, value=0.5, tile_r=8))
        refr = _reference(xr, pad_left, pad_right, mode, value=0.5)
        if not jnp.allclose(outr, refr, atol=1e-5):
            ok = False
            print(f"ragged mode {mode} mismatch")

    if ok:
        print("KERNEL_OK")
</pallas_src>

<mosaic_0001>
module attributes {stable_mosaic.version = 11 : i64} {
  func.func @_pad_kernel(%arg0: i32, %arg1: memref<8x16xf32, #tpu.memory_space<vmem>>, %arg2: memref<8x23xf32, #tpu.memory_space<vmem>>) attributes {dimension_semantics = [#tpu.dimension_semantics<parallel>], iteration_bounds = array<i64: 1>, scalar_prefetch = 0 : i64, scratch_operands = 0 : i64, tpu.core_type = #tpu.core_type<tc>, window_params = [{transform_indices = @transform_0, window_bounds = array<i64: 8, 16>}, {transform_indices = @transform_1, window_bounds = array<i64: 8, 23>}]} {
    %c0 = arith.constant 0 : index
    %c0_0 = arith.constant 0 : index
    %0 = vector.load %arg1[%c0, %c0_0] : memref<8x16xf32, #tpu.memory_space<vmem>>, vector<8x16xf32>
    %cst = arith.constant 5.000000e-01 : f32
    %1 = vector.broadcast %cst : f32 to vector<8x3xf32>
    %cst_1 = arith.constant 5.000000e-01 : f32
    %2 = vector.broadcast %cst_1 : f32 to vector<8x4xf32>
    %3 = tpu.concatenate %1, %0, %2 in 1 : vector<8x3xf32>, vector<8x16xf32>, vector<8x4xf32> -> vector<8x23xf32>
    %c0_2 = arith.constant 0 : index
    %c0_3 = arith.constant 0 : index
    %4 = vector.load %arg2[%c0_2, %c0_3] : memref<8x23xf32, #tpu.memory_space<vmem>>, vector<8x23xf32>
    tpu.vector_store %arg2[%c0_2, %c0_3], %3 {strides = array<i32>} : memref<8x23xf32, #tpu.memory_space<vmem>>, vector<8x23xf32>,
    return
  }
  func.func @transform_0(%arg0: i32) -> (i32, i32) {
    %c0_i32 = arith.constant 0 : i32
    %c0_i32_0 = arith.constant 0 : i32
    return %arg0, %c0_i32 : i32, i32
  }
  func.func @transform_1(%arg0: i32) -> (i32, i32) {
    %c0_i32 = arith.constant 0 : i32
    %c0_i32_0 = arith.constant 0 : i32
    return %arg0, %c0_i32 : i32, i32
  }
}

</mosaic_0001>

<bundles_post_ra>
// kernel: tpu_custom_call.1
= control target key start
LH: loop header
LB: loop body
LE: loop exit
PB: predicated region body
PF: predicated region fallthrough
CT: control target
= control target key end

     0   :  { %6 = vsyncpa [#allocation3], 0  ;;  %s125_s0 = inlined_call_operand.hbm [shape: f32[8,16], index: 0, kind: input, shape index: {}]   ;;  %s126_s1 = inlined_call_operand.hbm [shape: f32[8,23], index: 1, kind: output, shape index: {}]  }
   0x1   :  { %7 = vsyncpa [#allocation4], 0  ;;  %s13_s8 = sshll.u32 %s125_s0, 4  ;;  %s106_s9 = smov [#allocation2]   ;;  %s14_s8 = int_to_ptr.hbm [resolvable:$true] %s13_s8 }
   0x2   :  { %s15_s10 = sshll.u32 %s106_s9, 4  ;;  %s16_s10 = int_to_ptr.vmem [resolvable:$true] %s15_s10 }
   0x3   :  { %18 = dma.hbm_to_vmem [thread:$0]  %s14_s8, 128, %s16_s10, [#allocation3]  }
   0x4   :  { %102 = dma.done.wait [#allocation3], 128  }
   0x5   :  { %103 = vsyncadd [#allocation3], 4294967168  ;;  %v23_v0 = vld [vmem:[#allocation2] sm:$0xff]  ;;  %s107_s11 = smov 3   ;;  %vm28_vm0 = vcmask 23552   ;;  %s108_s12 = smov [#allocation5]  }
   0x6   :  { %25 = vrot.lane.b32.xlu0 %v23_v0, %s107_s11  ;;  %s39_s13 = sshll.u32 %s108_s12, 4  ;;  %s41_s16 = sshll.u32 %s126_s1, 4  ;;  %vm30_vm1 = vcmask 154624   ;;  %vm32_vm2 = vcmask 187392   ;;  %s40_s13 = int_to_ptr.vmem [resolvable:$true] %s39_s13  ;;  %s42_s16 = int_to_ptr.hbm [resolvable:$true] %s41_s16 }
  0x78   :  { %v26_v1 = vpop.permute.xlu0 %25 }
  0x79   :  { %v29_v2 = vsel %vm28_vm0, 0.5, %v26_v1 }
  0x7a   :  { %v31_v3 = vsel %vm30_vm1, %v29_v2, 0.5 }
  0x7b   :  { %33 = vst.msk [vmem:[#allocation5] sm:$0xff] %vm32_vm2, %v31_v3 }
  0x7c   :  { %44 = dma.vmem_to_hbm [thread:$0]  %s40_s13, 128, %s42_s16, [#allocation4]  }
  0x7d   :  { %104 = dma.done.wait [#allocation4], 128  }
  0x7e   :  { %105 = vsyncadd [#allocation4], 4294967168 }
  0x7f   :  { %49 = vsyncpa [#allocation3], 1 }
  0x80   :  { %50 = vsyncpa [#allocation4], 1 }

</bundles_post_ra>
